<compile_context>
chip_gen: v7x
topology: tpu7x:2x2x1
jax: 0.10.0
libtpu: 0.0.40
codegen_flags: <defaults>
</compile_context>

<pallas_src>
import jax
import jax.numpy as jnp
from jax.experimental import pallas as pl
from jax.experimental.pallas import tpu as pltpu

LANES = 128
ACC_ROWS = 64                          # resident accumulator rows per split (8x ILP vs (8,128))
BLOCK_BYTES = 2 * 1024 * 1024          # ~2 MiB of input per block per grid step
VMEM_LIMIT_BYTES = 32 * 1024 * 1024    # raises v5e's 16 MiB default; == v6e/v7x scoped default


def _round_up(x, m):
    return ((x + m - 1) // m) * m


def _cdiv(a, b):
    return (a + b - 1) // b


def _num_tensorcores():
    """TensorCores sharing one Pallas call: 2 on v7x, 1 on v5e/v6e (per perf review)."""
    try:
        kind = jax.devices()[0].device_kind.lower()
    except Exception:
        return 1
    return 2 if "7" in kind else 1


_NUM_TC = _num_tensorcores()


def _block_rows_for(r_dtype, f_dtype):
    """Rows per block so each input block is ~BLOCK_BYTES (4096 f32 / 8192 bf16)."""
    itemsize = max(jnp.dtype(r_dtype).itemsize, jnp.dtype(f_dtype).itemsize)
    rows = BLOCK_BYTES // (LANES * itemsize)
    return max(ACC_ROWS, (rows // ACC_ROWS) * ACC_ROWS)


# ----------------------------------------------------------------------------------
# FUSED path: many small features, one pallas_call, manual double-buffered DMA loop.
# ----------------------------------------------------------------------------------
def _make_fused_kernel(rows_list, weights):
    n_feat = len(rows_list)

    def kernel(*refs):
        r_refs = refs[:n_feat]                       # HBM (ANY) refs, shape (rows_i, 128)
        f_refs = refs[n_feat:2 * n_feat]
        o_ref = refs[2 * n_feat]                     # (8, 128) f32 weighted partial sums
        rbuf, fbuf, sem = refs[2 * n_feat + 1:2 * n_feat + 4]

        def start(idx, slot):
            rows = rows_list[idx]
            pltpu.make_async_copy(r_refs[idx], rbuf.at[slot, pl.ds(0, rows), :],
                                  sem.at[0, slot]).start()
            pltpu.make_async_copy(f_refs[idx], fbuf.at[slot, pl.ds(0, rows), :],
                                  sem.at[1, slot]).start()

        def wait(idx, slot):
            rows = rows_list[idx]
            pltpu.make_async_copy(r_refs[idx], rbuf.at[slot, pl.ds(0, rows), :],
                                  sem.at[0, slot]).wait()
            pltpu.make_async_copy(f_refs[idx], fbuf.at[slot, pl.ds(0, rows), :],
                                  sem.at[1, slot]).wait()

        start(0, 0)                                  # prime slot 0
        o_ref[...] = jnp.zeros_like(o_ref)

        # Static unroll: n_feat and every rows_i / weight_i are trace-time constants.
        for idx in range(n_feat):
            slot = idx % 2
            wait(idx, slot)
            if idx + 1 < n_feat:
                start(idx + 1, 1 - slot)             # prefetch next feature while reducing
            rows = rows_list[idx]
            w = jnp.float32(weights[idx])            # 1 / numel, baked in
            a = jnp.abs(rbuf[slot, pl.ds(0, rows), :].astype(jnp.float32)
                        - fbuf[slot, pl.ds(0, rows), :].astype(jnp.float32))
            if rows % 8 == 0:
                o_ref[...] += w * a.reshape(-1, 8, LANES).sum(axis=0)   # pure-VPU partials
            else:
                o_ref[0:1, :] += w * jnp.sum(a, axis=0, keepdims=True)  # tiny feature

    return kernel


def _fused_weighted_sum(items):
    """items: list of (r2, f2, rows, 1/numel); returns sum_i |r_i - f_i| / n_i (prefix part)."""
    rows_list = [it[2] for it in items]
    weights = [it[3] for it in items]
    n_feat = len(items)
    r_dtype = jnp.dtype(items[0][0].dtype)
    f_dtype = jnp.dtype(items[0][1].dtype)
    buf_rows = _round_up(max(rows_list), 8)

    n_elems = sum(r * LANES for r in rows_list)
    bytes_accessed = n_elems * (r_dtype.itemsize + f_dtype.itemsize) + 8 * LANES * 4

    partials = pl.pallas_call(
        _make_fused_kernel(rows_list, weights),
        out_shape=jax.ShapeDtypeStruct((8, LANES), jnp.float32),
        grid_spec=pltpu.PrefetchScalarGridSpec(
            num_scalar_prefetch=0,
            grid=(1,),
            in_specs=[pl.BlockSpec(memory_space=pl.ANY)] * (2 * n_feat),
            out_specs=pl.BlockSpec((8, LANES), lambda i: (0, 0)),
            scratch_shapes=[
                pltpu.VMEM((2, buf_rows, LANES), r_dtype),
                pltpu.VMEM((2, buf_rows, LANES), f_dtype),
                pltpu.SemaphoreType.DMA((2, 2)),
            ],
        ),
        compiler_params=pltpu.CompilerParams(
            dimension_semantics=("arbitrary",),
            vmem_limit_bytes=VMEM_LIMIT_BYTES,
        ),
        cost_estimate=pl.CostEstimate(
            flops=3 * n_elems, transcendentals=0, bytes_accessed=bytes_accessed),
    )(*[it[0] for it in items], *[it[1] for it in items])

    return jnp.sum(partials)


# ----------------------------------------------------------------------------------
# TILED path: one large feature, BlockSpec auto-pipelining, 2 MiB blocks.
# ----------------------------------------------------------------------------------
def _make_tiled_kernel(rows, block_rows, bps, nb_full, need_mask):
    def kernel(r_ref, f_ref, o_ref):
        i = pl.program_id(1)

        @pl.when(i == 0)
        def _init():
            o_ref[...] = jnp.zeros_like(o_ref)

        a = jnp.abs(r_ref[...].astype(jnp.float32) - f_ref[...].astype(jnp.float32))

        if not need_mask:
            o_ref[...] += a.reshape(-1, ACC_ROWS, LANES).sum(axis=0)
        else:
            g = pl.program_id(0) * bps + i

            @pl.when(g < nb_full)                    # hot blocks: no mask work at all
            def _full_block():
                o_ref[...] += a.reshape(-1, ACC_ROWS, LANES).sum(axis=0)

            @pl.when(g >= nb_full)                   # ragged tail / clamped ghost block only
            def _masked_block():
                row_ids = g * block_rows + jax.lax.broadcasted_iota(
                    jnp.int32, (block_rows, LANES), 0)
                am = jnp.where(row_ids < rows, a, 0.0)
                o_ref[...] += am.reshape(-1, ACC_ROWS, LANES).sum(axis=0)

    return kernel


def _tiled_sum(r2, f2, rows, block_rows):
    nb = _cdiv(rows, block_rows)
    num_splits = _NUM_TC if nb >= 2 else 1
    bps = _cdiv(nb, num_splits)
    nb_full = rows // block_rows
    need_mask = num_splits * bps * block_rows > rows     # ragged tail and/or ghost block
    max_block = nb - 1

    def in_index_map(p, i):
        g = p * bps + i
        if need_mask:
            g = jnp.minimum(g, max_block)                # ghost re-reads last block; masked to 0
        return (g, 0)

    n_elems = rows * LANES
    bytes_accessed = (n_elems * (jnp.dtype(r2.dtype).itemsize + jnp.dtype(f2.dtype).itemsize)
                      + num_splits * ACC_ROWS * LANES * 4)

    partials = pl.pallas_call(
        _make_tiled_kernel(rows, block_rows, bps, nb_full, need_mask),
        out_shape=jax.ShapeDtypeStruct((num_splits * ACC_ROWS, LANES), jnp.float32),
        grid_spec=pltpu.PrefetchScalarGridSpec(
            num_scalar_prefetch=0,
            grid=(num_splits, bps),
            in_specs=[
                pl.BlockSpec((block_rows, LANES), in_index_map),
                pl.BlockSpec((block_rows, LANES), in_index_map),
            ],
            out_specs=pl.BlockSpec((ACC_ROWS, LANES), lambda p, i: (p, 0)),
        ),
        compiler_params=pltpu.CompilerParams(
            dimension_semantics=("parallel", "arbitrary"),
            vmem_limit_bytes=VMEM_LIMIT_BYTES,
        ),
        cost_estimate=pl.CostEstimate(
            flops=3 * n_elems, transcendentals=0, bytes_accessed=bytes_accessed),
    )(r2, f2)

    return jnp.sum(partials)


# ----------------------------------------------------------------------------------
# Public API: JAX/Pallas equivalent of FeatureMatchingLoss.forward.
# ----------------------------------------------------------------------------------
def feature_matching_loss(real_features, fake_features):
    is_list = isinstance(real_features, (list, tuple))
    reals = list(real_features) if is_list else [real_features]
    fakes = list(fake_features) if is_list else [fake_features]
    assert len(reals) == len(fakes), "feature lists must have the same length"

    total = jnp.float32(0.0)
    small_groups = {}                                   # (r_dtype, f_dtype) -> [(r2,f2,rows,w)]

    for r, f in zip(reals, fakes):
        assert r.shape == f.shape, "feature shapes must match"
        n = r.size
        w = 1.0 / n                                     # per-tensor mean weight
        rf = r.reshape(-1)
        ff = f.reshape(-1)
        rows = n // LANES
        aligned = rows * LANES

        if aligned < n:                                 # <128-element lane tail: scalar glue
            rt = rf[aligned:].astype(jnp.float32)
            ft = ff[aligned:].astype(jnp.float32)
            total = total + jnp.float32(w) * jnp.sum(jnp.abs(rt - ft))

        if rows == 0:
            continue

        r2 = (rf[:aligned] if aligned < n else rf).reshape(rows, LANES)
        f2 = (ff[:aligned] if aligned < n else ff).reshape(rows, LANES)

        block_rows = _block_rows_for(r2.dtype, f2.dtype)
        if rows <= block_rows:
            key = (jnp.dtype(r2.dtype).name, jnp.dtype(f2.dtype).name)
            small_groups.setdefault(key, []).append((r2, f2, rows, w))
        else:
            total = total + jnp.float32(w) * _tiled_sum(r2, f2, rows, block_rows)

    for items in small_groups.values():
        total = total + _fused_weighted_sum(items)      # one fused call per dtype group

    return total / jnp.float32(len(reals))


# ----------------------------------------------------------------------------------
# Self-test
# ----------------------------------------------------------------------------------
def _ref_mean_abs(r, f):
    return jnp.mean(jnp.abs(r.astype(jnp.float32) - f.astype(jnp.float32)))


def _ref_loss(reals, fakes):
    if isinstance(reals, (list, tuple)):
        return sum(_ref_mean_abs(r, f) for r, f in zip(reals, fakes)) / len(reals)
    return _ref_mean_abs(reals, fakes)


if __name__ == "__main__":
    key = jax.random.PRNGKey(0)

    # 1) Typical multi-scale discriminator pyramid (all small -> ONE fused pallas_call).
    shapes = [(2, 4, 16, 16), (2, 8, 8, 8), (2, 16, 4, 4)]
    keys = jax.random.split(key, 2 * len(shapes))
    real_feats = [jax.random.normal(keys[2 * i], s, dtype=jnp.float32)
                  for i, s in enumerate(shapes)]
    fake_feats = [jax.random.normal(keys[2 * i + 1], s, dtype=jnp.float32)
                  for i, s in enumerate(shapes)]
    loss_list = jax.block_until_ready(feature_matching_loss(real_feats, fake_feats))
    assert jnp.allclose(loss_list, _ref_loss(real_feats, fake_feats), rtol=1e-4, atol=1e-6)

    # 2) Single-tensor case.
    loss_single = jax.block_until_ready(
        feature_matching_loss(real_feats[0], fake_feats[0]))
    assert jnp.allclose(loss_single, _ref_mean_abs(real_feats[0], fake_feats[0]),
                        rtol=1e-4, atol=1e-6)

    # 3) Mixed list: large feature (tiled path: multi-block grid + pl.when-gated ragged block)
    #    + small feature (fused path) + sub-128-element feature (pure scalar glue).
    kb = jax.random.split(jax.random.PRNGKey(1), 6)
    big_r = jax.random.normal(kb[0], (2, 24, 100, 128), dtype=jnp.float32)   # 4800 rows
    big_f = jax.random.normal(kb[1], (2, 24, 100, 128), dtype=jnp.float32)
    sm_r = jax.random.normal(kb[2], (2, 8, 8, 8), dtype=jnp.float32)
    sm_f = jax.random.normal(kb[3], (2, 8, 8, 8), dtype=jnp.float32)
    tiny_r = jax.random.normal(kb[4], (3, 5, 7), dtype=jnp.float32)          # 105 elems
    tiny_f = jax.random.normal(kb[5], (3, 5, 7), dtype=jnp.float32)
    mixed_r, mixed_f = [big_r, sm_r, tiny_r], [big_f, sm_f, tiny_f]
    loss_mixed = jax.block_until_ready(feature_matching_loss(mixed_r, mixed_f))
    assert jnp.allclose(loss_mixed, _ref_loss(mixed_r, mixed_f), rtol=1e-4, atol=1e-6)

    # 4) bf16 features in their native dtype (kernel upcasts in-register).
    kh = jax.random.split(jax.random.PRNGKey(2), 4)
    bf_r = [jax.random.normal(kh[0], (2, 8, 16, 16), dtype=jnp.bfloat16),
            jax.random.normal(kh[1], (2, 4, 8, 8), dtype=jnp.bfloat16)]
    bf_f = [jax.random.normal(kh[2], (2, 8, 16, 16), dtype=jnp.bfloat16),
            jax.random.normal(kh[3], (2, 4, 8, 8), dtype=jnp.bfloat16)]
    loss_bf = jax.block_until_ready(feature_matching_loss(bf_r, bf_f))
    assert jnp.allclose(loss_bf, _ref_loss(bf_r, bf_f), rtol=1e-4, atol=1e-6)

    # 5) Odd element count (not a multiple of 128): aligned-prefix kernel + JAX lane tail.
    ko = jax.random.split(jax.random.PRNGKey(3), 2)
    odd_r = jax.random.normal(ko[0], (2, 3, 5, 7), dtype=jnp.float32)        # 210 elems
    odd_f = jax.random.normal(ko[1], (2, 3, 5, 7), dtype=jnp.float32)
    loss_odd = jax.block_until_ready(feature_matching_loss(odd_r, odd_f))
    assert jnp.allclose(loss_odd, _ref_mean_abs(odd_r, odd_f), rtol=1e-4, atol=1e-6)

    print("KERNEL_OK")
</pallas_src>

<mosaic_0001>
module attributes {stable_mosaic.version = 11 : i64} {
  func.func @kernel(%arg0: i32, %arg1: memref<16x128xf32, #tpu.memory_space<any>>, %arg2: memref<8x128xf32, #tpu.memory_space<any>>, %arg3: memref<4x128xf32, #tpu.memory_space<any>>, %arg4: memref<16x128xf32, #tpu.memory_space<any>>, %arg5: memref<8x128xf32, #tpu.memory_space<any>>, %arg6: memref<4x128xf32, #tpu.memory_space<any>>, %arg7: memref<8x128xf32, #tpu.memory_space<vmem>>, %arg8: memref<2x16x128xf32, #tpu.memory_space<vmem>>, %arg9: memref<2x16x128xf32, #tpu.memory_space<vmem>>, %arg10: memref<2x2x!tpu.dma_semaphore, #tpu.memory_space<semaphore_mem>>) attributes {dimension_semantics = [#tpu.dimension_semantics<arbitrary>], iteration_bounds = array<i64: 1>, scalar_prefetch = 0 : i64, scratch_operands = 3 : i64, tpu.core_type = #tpu.core_type<tc>, window_params = [{}, {}, {}, {}, {}, {}, {pipeline_mode = #tpu.pipeline_mode<synchronous>, transform_indices = @transform_6, window_bounds = array<i64: 8, 128>}]} {
    %c0_i32 = arith.constant 0 : i32
    %c0_i32_0 = arith.constant 0 : i32
    %c0_i32_1 = arith.constant 0 : i32
    %c0_i32_2 = arith.constant 0 : i32
    %c0_i32_3 = arith.constant 0 : i32
    %0 = tpu.memref_slice %arg8[%c0_i32, %c0_i32_2, %c0_i32_3] : memref<2x16x128xf32, #tpu.memory_space<vmem>> -> memref<1x16x128xf32, #tpu.memory_space<vmem>>
    %1 = tpu.memref_squeeze %0 : memref<1x16x128xf32, #tpu.memory_space<vmem>> -> memref<16x128xf32, #tpu.memory_space<vmem>>
    %2 = tpu.memref_slice %arg10[%c0_i32_0, %c0_i32_1] : memref<2x2x!tpu.dma_semaphore, #tpu.memory_space<semaphore_mem>> -> memref<1x1x!tpu.dma_semaphore, #tpu.memory_space<semaphore_mem>>
    %3 = tpu.memref_squeeze %2 : memref<1x1x!tpu.dma_semaphore, #tpu.memory_space<semaphore_mem>> -> memref<!tpu.dma_semaphore, #tpu.memory_space<semaphore_mem>>
    tpu.enqueue_dma source(%arg1 : memref<16x128xf32, #tpu.memory_space<any>>) target(%1 : memref<16x128xf32, #tpu.memory_space<vmem>>) target_semaphore(%3 : memref<!tpu.dma_semaphore, #tpu.memory_space<semaphore_mem>>)
    %c0_i32_4 = arith.constant 0 : i32
    %c1_i32 = arith.constant 1 : i32
    %c0_i32_5 = arith.constant 0 : i32
    %c0_i32_6 = arith.constant 0 : i32
    %c0_i32_7 = arith.constant 0 : i32
    %4 = tpu.memref_slice %arg9[%c0_i32_4, %c0_i32_6, %c0_i32_7] : memref<2x16x128xf32, #tpu.memory_space<vmem>> -> memref<1x16x128xf32, #tpu.memory_space<vmem>>
    %5 = tpu.memref_squeeze %4 : memref<1x16x128xf32, #tpu.memory_space<vmem>> -> memref<16x128xf32, #tpu.memory_space<vmem>>
    %6 = tpu.memref_slice %arg10[%c1_i32, %c0_i32_5] : memref<2x2x!tpu.dma_semaphore, #tpu.memory_space<semaphore_mem>> -> memref<1x1x!tpu.dma_semaphore, #tpu.memory_space<semaphore_mem>>
    %7 = tpu.memref_squeeze %6 : memref<1x1x!tpu.dma_semaphore, #tpu.memory_space<semaphore_mem>> -> memref<!tpu.dma_semaphore, #tpu.memory_space<semaphore_mem>>
    tpu.enqueue_dma source(%arg4 : memref<16x128xf32, #tpu.memory_space<any>>) target(%5 : memref<16x128xf32, #tpu.memory_space<vmem>>) target_semaphore(%7 : memref<!tpu.dma_semaphore, #tpu.memory_space<semaphore_mem>>)
    %cst = arith.constant 0.000000e+00 : f32
    %8 = vector.broadcast %cst : f32 to vector<8x128xf32>
    %c0 = arith.constant 0 : index
    %c0_8 = arith.constant 0 : index
    %9 = vector.load %arg7[%c0, %c0_8] : memref<8x128xf32, #tpu.memory_space<vmem>>, vector<8x128xf32>
    tpu.vector_store %arg7[%c0, %c0_8], %8 {strides = array<i32>} : memref<8x128xf32, #tpu.memory_space<vmem>>, vector<8x128xf32>,
    %c0_i32_9 = arith.constant 0 : i32
    %c0_i32_10 = arith.constant 0 : i32
    %c0_i32_11 = arith.constant 0 : i32
    %c0_i32_12 = arith.constant 0 : i32
    %c0_i32_13 = arith.constant 0 : i32
    %10 = tpu.memref_slice %arg8[%c0_i32_9, %c0_i32_12, %c0_i32_13] : memref<2x16x128xf32, #tpu.memory_space<vmem>> -> memref<1x16x128xf32, #tpu.memory_space<vmem>>
    %11 = tpu.memref_squeeze %10 : memref<1x16x128xf32, #tpu.memory_space<vmem>> -> memref<16x128xf32, #tpu.memory_space<vmem>>
    %12 = tpu.memref_slice %arg10[%c0_i32_10, %c0_i32_11] : memref<2x2x!tpu.dma_semaphore, #tpu.memory_space<semaphore_mem>> -> memref<1x1x!tpu.dma_semaphore, #tpu.memory_space<semaphore_mem>>
    %13 = tpu.memref_squeeze %12 : memref<1x1x!tpu.dma_semaphore, #tpu.memory_space<semaphore_mem>> -> memref<!tpu.dma_semaphore, #tpu.memory_space<semaphore_mem>>
    tpu.wait_dma2 semaphore(%13 : memref<!tpu.dma_semaphore, #tpu.memory_space<semaphore_mem>>) src(%arg1 : memref<16x128xf32, #tpu.memory_space<any>>) dst(%11 : memref<16x128xf32, #tpu.memory_space<vmem>>)
    %c0_i32_14 = arith.constant 0 : i32
    %c1_i32_15 = arith.constant 1 : i32
    %c0_i32_16 = arith.constant 0 : i32
    %c0_i32_17 = arith.constant 0 : i32
    %c0_i32_18 = arith.constant 0 : i32
    %14 = tpu.memref_slice %arg9[%c0_i32_14, %c0_i32_17, %c0_i32_18] : memref<2x16x128xf32, #tpu.memory_space<vmem>> -> memref<1x16x128xf32, #tpu.memory_space<vmem>>
    %15 = tpu.memref_squeeze %14 : memref<1x16x128xf32, #tpu.memory_space<vmem>> -> memref<16x128xf32, #tpu.memory_space<vmem>>
    %16 = tpu.memref_slice %arg10[%c1_i32_15, %c0_i32_16] : memref<2x2x!tpu.dma_semaphore, #tpu.memory_space<semaphore_mem>> -> memref<1x1x!tpu.dma_semaphore, #tpu.memory_space<semaphore_mem>>
    %17 = tpu.memref_squeeze %16 : memref<1x1x!tpu.dma_semaphore, #tpu.memory_space<semaphore_mem>> -> memref<!tpu.dma_semaphore, #tpu.memory_space<semaphore_mem>>
    tpu.wait_dma2 semaphore(%17 : memref<!tpu.dma_semaphore, #tpu.memory_space<semaphore_mem>>) src(%arg4 : memref<16x128xf32, #tpu.memory_space<any>>) dst(%15 : memref<16x128xf32, #tpu.memory_space<vmem>>)
    %c1_i32_19 = arith.constant 1 : i32
    %c0_i32_20 = arith.constant 0 : i32
    %c1_i32_21 = arith.constant 1 : i32
    %c0_i32_22 = arith.constant 0 : i32
    %c0_i32_23 = arith.constant 0 : i32
    %18 = tpu.memref_slice %arg8[%c1_i32_19, %c0_i32_22, %c0_i32_23] : memref<2x16x128xf32, #tpu.memory_space<vmem>> -> memref<1x8x128xf32, #tpu.memory_space<vmem>>
    %19 = tpu.memref_squeeze %18 : memref<1x8x128xf32, #tpu.memory_space<vmem>> -> memref<8x128xf32, #tpu.memory_space<vmem>>
    %20 = tpu.memref_slice %arg10[%c0_i32_20, %c1_i32_21] : memref<2x2x!tpu.dma_semaphore, #tpu.memory_space<semaphore_mem>> -> memref<1x1x!tpu.dma_semaphore, #tpu.memory_space<semaphore_mem>>
    %21 = tpu.memref_squeeze %20 : memref<1x1x!tpu.dma_semaphore, #tpu.memory_space<semaphore_mem>> -> memref<!tpu.dma_semaphore, #tpu.memory_space<semaphore_mem>>
    tpu.enqueue_dma source(%arg2 : memref<8x128xf32, #tpu.memory_space<any>>) target(%19 : memref<8x128xf32, #tpu.memory_space<vmem>>) target_semaphore(%21 : memref<!tpu.dma_semaphore, #tpu.memory_space<semaphore_mem>>)
    %c1_i32_24 = arith.constant 1 : i32
    %c1_i32_25 = arith.constant 1 : i32
    %c1_i32_26 = arith.constant 1 : i32
    %c0_i32_27 = arith.constant 0 : i32
    %c0_i32_28 = arith.constant 0 : i32
    %22 = tpu.memref_slice %arg9[%c1_i32_24, %c0_i32_27, %c0_i32_28] : memref<2x16x128xf32, #tpu.memory_space<vmem>> -> memref<1x8x128xf32, #tpu.memory_space<vmem>>
    %23 = tpu.memref_squeeze %22 : memref<1x8x128xf32, #tpu.memory_space<vmem>> -> memref<8x128xf32, #tpu.memory_space<vmem>>
    %24 = tpu.memref_slice %arg10[%c1_i32_25, %c1_i32_26] : memref<2x2x!tpu.dma_semaphore, #tpu.memory_space<semaphore_mem>> -> memref<1x1x!tpu.dma_semaphore, #tpu.memory_space<semaphore_mem>>
    %25 = tpu.memref_squeeze %24 : memref<1x1x!tpu.dma_semaphore, #tpu.memory_space<semaphore_mem>> -> memref<!tpu.dma_semaphore, #tpu.memory_space<semaphore_mem>>
    tpu.enqueue_dma source(%arg5 : memref<8x128xf32, #tpu.memory_space<any>>) target(%23 : memref<8x128xf32, #tpu.memory_space<vmem>>) target_semaphore(%25 : memref<!tpu.dma_semaphore, #tpu.memory_space<semaphore_mem>>)
    %c0_29 = arith.constant 0 : index
    %c0_30 = arith.constant 0 : index
    %c0_31 = arith.constant 0 : index
    %26 = vector.load %arg8[%c0_29, %c0_30, %c0_31] : memref<2x16x128xf32, #tpu.memory_space<vmem>>, vector<1x16x128xf32>
    %27 = vector.shape_cast %26 : vector<1x16x128xf32> to vector<16x128xf32>
    %c0_32 = arith.constant 0 : index
    %c0_33 = arith.constant 0 : index
    %c0_34 = arith.constant 0 : index
    %28 = vector.load %arg9[%c0_32, %c0_33, %c0_34] : memref<2x16x128xf32, #tpu.memory_space<vmem>>, vector<1x16x128xf32>
    %29 = vector.shape_cast %28 : vector<1x16x128xf32> to vector<16x128xf32>
    %30 = arith.subf %27, %29 : vector<16x128xf32>
    %31 = math.absf %30 : vector<16x128xf32>
    %c0_35 = arith.constant 0 : index
    %c0_36 = arith.constant 0 : index
    %32 = vector.load %arg7[%c0_35, %c0_36] : memref<8x128xf32, #tpu.memory_space<vmem>>, vector<8x128xf32>
    %33 = vector.shape_cast %31 : vector<16x128xf32> to vector<2x8x128xf32>
    %cst_37 = arith.constant dense<0.000000e+00> : vector<8x128xf32>
    %34 = vector.multi_reduction <add>, %33, %cst_37 [0] : vector<2x8x128xf32> to vector<8x128xf32>
    %cst_38 = arith.constant 4.8828125E-4 : f32
    %35 = vector.broadcast %cst_38 : f32 to vector<8x128xf32>
    %36 = arith.mulf %35, %34 : vector<8x128xf32>
    %37 = arith.addf %32, %36 : vector<8x128xf32>
    %c0_39 = arith.constant 0 : index
    %c0_40 = arith.constant 0 : index
    %38 = vector.load %arg7[%c0_39, %c0_40] : memref<8x128xf32, #tpu.memory_space<vmem>>, vector<8x128xf32>
    tpu.vector_store %arg7[%c0_39, %c0_40], %37 {strides = array<i32>} : memref<8x128xf32, #tpu.memory_space<vmem>>, vector<8x128xf32>,
    %c1_i32_41 = arith.constant 1 : i32
    %c0_i32_42 = arith.constant 0 : i32
    %c1_i32_43 = arith.constant 1 : i32
    %c0_i32_44 = arith.constant 0 : i32
    %c0_i32_45 = arith.constant 0 : i32
    %39 = tpu.memref_slice %arg8[%c1_i32_41, %c0_i32_44, %c0_i32_45] : memref<2x16x128xf32, #tpu.memory_space<vmem>> -> memref<1x8x128xf32, #tpu.memory_space<vmem>>
    %40 = tpu.memref_squeeze %39 : memref<1x8x128xf32, #tpu.memory_space<vmem>> -> memref<8x128xf32, #tpu.memory_space<vmem>>
    %41 = tpu.memref_slice %arg10[%c0_i32_42, %c1_i32_43] : memref<2x2x!tpu.dma_semaphore, #tpu.memory_space<semaphore_mem>> -> memref<1x1x!tpu.dma_semaphore, #tpu.memory_space<semaphore_mem>>
    %42 = tpu.memref_squeeze %41 : memref<1x1x!tpu.dma_semaphore, #tpu.memory_space<semaphore_mem>> -> memref<!tpu.dma_semaphore, #tpu.memory_space<semaphore_mem>>
    tpu.wait_dma2 semaphore(%42 : memref<!tpu.dma_semaphore, #tpu.memory_space<semaphore_mem>>) src(%arg2 : memref<8x128xf32, #tpu.memory_space<any>>) dst(%40 : memref<8x128xf32, #tpu.memory_space<vmem>>)
    %c1_i32_46 = arith.constant 1 : i32
    %c1_i32_47 = arith.constant 1 : i32
    %c1_i32_48 = arith.constant 1 : i32
    %c0_i32_49 = arith.constant 0 : i32
    %c0_i32_50 = arith.constant 0 : i32
    %43 = tpu.memref_slice %arg9[%c1_i32_46, %c0_i32_49, %c0_i32_50] : memref<2x16x128xf32, #tpu.memory_space<vmem>> -> memref<1x8x128xf32, #tpu.memory_space<vmem>>
    %44 = tpu.memref_squeeze %43 : memref<1x8x128xf32, #tpu.memory_space<vmem>> -> memref<8x128xf32, #tpu.memory_space<vmem>>
    %45 = tpu.memref_slice %arg10[%c1_i32_47, %c1_i32_48] : memref<2x2x!tpu.dma_semaphore, #tpu.memory_space<semaphore_mem>> -> memref<1x1x!tpu.dma_semaphore, #tpu.memory_space<semaphore_mem>>
    %46 = tpu.memref_squeeze %45 : memref<1x1x!tpu.dma_semaphore, #tpu.memory_space<semaphore_mem>> -> memref<!tpu.dma_semaphore, #tpu.memory_space<semaphore_mem>>
    tpu.wait_dma2 semaphore(%46 : memref<!tpu.dma_semaphore, #tpu.memory_space<semaphore_mem>>) src(%arg5 : memref<8x128xf32, #tpu.memory_space<any>>) dst(%44 : memref<8x128xf32, #tpu.memory_space<vmem>>)
    %c0_i32_51 = arith.constant 0 : i32
    %c0_i32_52 = arith.constant 0 : i32
    %c0_i32_53 = arith.constant 0 : i32
    %c0_i32_54 = arith.constant 0 : i32
    %c0_i32_55 = arith.constant 0 : i32
    %47 = tpu.memref_slice %arg8[%c0_i32_51, %c0_i32_54, %c0_i32_55] : memref<2x16x128xf32, #tpu.memory_space<vmem>> -> memref<1x4x128xf32, #tpu.memory_space<vmem>>
    %48 = tpu.memref_squeeze %47 : memref<1x4x128xf32, #tpu.memory_space<vmem>> -> memref<4x128xf32, #tpu.memory_space<vmem>>
    %49 = tpu.memref_slice %arg10[%c0_i32_52, %c0_i32_53] : memref<2x2x!tpu.dma_semaphore, #tpu.memory_space<semaphore_mem>> -> memref<1x1x!tpu.dma_semaphore, #tpu.memory_space<semaphore_mem>>
    %50 = tpu.memref_squeeze %49 : memref<1x1x!tpu.dma_semaphore, #tpu.memory_space<semaphore_mem>> -> memref<!tpu.dma_semaphore, #tpu.memory_space<semaphore_mem>>
    tpu.enqueue_dma source(%arg3 : memref<4x128xf32, #tpu.memory_space<any>>) target(%48 : memref<4x128xf32, #tpu.memory_space<vmem>>) target_semaphore(%50 : memref<!tpu.dma_semaphore, #tpu.memory_space<semaphore_mem>>)
    %c0_i32_56 = arith.constant 0 : i32
    %c1_i32_57 = arith.constant 1 : i32
    %c0_i32_58 = arith.constant 0 : i32
    %c0_i32_59 = arith.constant 0 : i32
    %c0_i32_60 = arith.constant 0 : i32
    %51 = tpu.memref_slice %arg9[%c0_i32_56, %c0_i32_59, %c0_i32_60] : memref<2x16x128xf32, #tpu.memory_space<vmem>> -> memref<1x4x128xf32, #tpu.memory_space<vmem>>
    %52 = tpu.memref_squeeze %51 : memref<1x4x128xf32, #tpu.memory_space<vmem>> -> memref<4x128xf32, #tpu.memory_space<vmem>>
    %53 = tpu.memref_slice %arg10[%c1_i32_57, %c0_i32_58] : memref<2x2x!tpu.dma_semaphore, #tpu.memory_space<semaphore_mem>> -> memref<1x1x!tpu.dma_semaphore, #tpu.memory_space<semaphore_mem>>
    %54 = tpu.memref_squeeze %53 : memref<1x1x!tpu.dma_semaphore, #tpu.memory_space<semaphore_mem>> -> memref<!tpu.dma_semaphore, #tpu.memory_space<semaphore_mem>>
    tpu.enqueue_dma source(%arg6 : memref<4x128xf32, #tpu.memory_space<any>>) target(%52 : memref<4x128xf32, #tpu.memory_space<vmem>>) target_semaphore(%54 : memref<!tpu.dma_semaphore, #tpu.memory_space<semaphore_mem>>)
    %c1 = arith.constant 1 : index
    %c0_61 = arith.constant 0 : index
    %c0_62 = arith.constant 0 : index
    %55 = vector.load %arg8[%c1, %c0_61, %c0_62] : memref<2x16x128xf32, #tpu.memory_space<vmem>>, vector<1x8x128xf32>
    %56 = vector.shape_cast %55 : vector<1x8x128xf32> to vector<8x128xf32>
    %c1_63 = arith.constant 1 : index
    %c0_64 = arith.constant 0 : index
    %c0_65 = arith.constant 0 : index
    %57 = vector.load %arg9[%c1_63, %c0_64, %c0_65] : memref<2x16x128xf32, #tpu.memory_space<vmem>>, vector<1x8x128xf32>
    %58 = vector.shape_cast %57 : vector<1x8x128xf32> to vector<8x128xf32>
    %59 = arith.subf %56, %58 : vector<8x128xf32>
    %60 = math.absf %59 : vector<8x128xf32>
    %c0_66 = arith.constant 0 : index
    %c0_67 = arith.constant 0 : index
    %61 = vector.load %arg7[%c0_66, %c0_67] : memref<8x128xf32, #tpu.memory_space<vmem>>, vector<8x128xf32>
    %62 = vector.shape_cast %60 : vector<8x128xf32> to vector<1x8x128xf32>
    %cst_68 = arith.constant dense<0.000000e+00> : vector<8x128xf32>
    %63 = vector.multi_reduction <add>, %62, %cst_68 [0] : vector<1x8x128xf32> to vector<8x128xf32>
    %cst_69 = arith.constant 9.765625E-4 : f32
    %64 = vector.broadcast %cst_69 : f32 to vector<8x128xf32>
    %65 = arith.mulf %64, %63 : vector<8x128xf32>
    %66 = arith.addf %61, %65 : vector<8x128xf32>
    %c0_70 = arith.constant 0 : index
    %c0_71 = arith.constant 0 : index
    %67 = vector.load %arg7[%c0_70, %c0_71] : memref<8x128xf32, #tpu.memory_space<vmem>>, vector<8x128xf32>
    tpu.vector_store %arg7[%c0_70, %c0_71], %66 {strides = array<i32>} : memref<8x128xf32, #tpu.memory_space<vmem>>, vector<8x128xf32>,
    %c0_i32_72 = arith.constant 0 : i32
    %c0_i32_73 = arith.constant 0 : i32
    %c0_i32_74 = arith.constant 0 : i32
    %c0_i32_75 = arith.constant 0 : i32
    %c0_i32_76 = arith.constant 0 : i32
    %68 = tpu.memref_slice %arg8[%c0_i32_72, %c0_i32_75, %c0_i32_76] : memref<2x16x128xf32, #tpu.memory_space<vmem>> -> memref<1x4x128xf32, #tpu.memory_space<vmem>>
    %69 = tpu.memref_squeeze %68 : memref<1x4x128xf32, #tpu.memory_space<vmem>> -> memref<4x128xf32, #tpu.memory_space<vmem>>
    %70 = tpu.memref_slice %arg10[%c0_i32_73, %c0_i32_74] : memref<2x2x!tpu.dma_semaphore, #tpu.memory_space<semaphore_mem>> -> memref<1x1x!tpu.dma_semaphore, #tpu.memory_space<semaphore_mem>>
    %71 = tpu.memref_squeeze %70 : memref<1x1x!tpu.dma_semaphore, #tpu.memory_space<semaphore_mem>> -> memref<!tpu.dma_semaphore, #tpu.memory_space<semaphore_mem>>
    tpu.wait_dma2 semaphore(%71 : memref<!tpu.dma_semaphore, #tpu.memory_space<semaphore_mem>>) src(%arg3 : memref<4x128xf32, #tpu.memory_space<any>>) dst(%69 : memref<4x128xf32, #tpu.memory_space<vmem>>)
    %c0_i32_77 = arith.constant 0 : i32
    %c1_i32_78 = arith.constant 1 : i32
    %c0_i32_79 = arith.constant 0 : i32
    %c0_i32_80 = arith.constant 0 : i32
    %c0_i32_81 = arith.constant 0 : i32
    %72 = tpu.memref_slice %arg9[%c0_i32_77, %c0_i32_80, %c0_i32_81] : memref<2x16x128xf32, #tpu.memory_space<vmem>> -> memref<1x4x128xf32, #tpu.memory_space<vmem>>
    %73 = tpu.memref_squeeze %72 : memref<1x4x128xf32, #tpu.memory_space<vmem>> -> memref<4x128xf32, #tpu.memory_space<vmem>>
    %74 = tpu.memref_slice %arg10[%c1_i32_78, %c0_i32_79] : memref<2x2x!tpu.dma_semaphore, #tpu.memory_space<semaphore_mem>> -> memref<1x1x!tpu.dma_semaphore, #tpu.memory_space<semaphore_mem>>
    %75 = tpu.memref_squeeze %74 : memref<1x1x!tpu.dma_semaphore, #tpu.memory_space<semaphore_mem>> -> memref<!tpu.dma_semaphore, #tpu.memory_space<semaphore_mem>>
    tpu.wait_dma2 semaphore(%75 : memref<!tpu.dma_semaphore, #tpu.memory_space<semaphore_mem>>) src(%arg6 : memref<4x128xf32, #tpu.memory_space<any>>) dst(%73 : memref<4x128xf32, #tpu.memory_space<vmem>>)
    %c0_82 = arith.constant 0 : index
    %c0_83 = arith.constant 0 : index
    %c0_84 = arith.constant 0 : index
    %76 = vector.load %arg8[%c0_82, %c0_83, %c0_84] : memref<2x16x128xf32, #tpu.memory_space<vmem>>, vector<1x4x128xf32>
    %77 = vector.shape_cast %76 : vector<1x4x128xf32> to vector<4x128xf32>
    %c0_85 = arith.constant 0 : index
    %c0_86 = arith.constant 0 : index
    %c0_87 = arith.constant 0 : index
    %78 = vector.load %arg9[%c0_85, %c0_86, %c0_87] : memref<2x16x128xf32, #tpu.memory_space<vmem>>, vector<1x4x128xf32>
    %79 = vector.shape_cast %78 : vector<1x4x128xf32> to vector<4x128xf32>
    %80 = arith.subf %77, %79 : vector<4x128xf32>
    %81 = math.absf %80 : vector<4x128xf32>
    %c0_88 = arith.constant 0 : index
    %c0_89 = arith.constant 0 : index
    %82 = vector.load %arg7[%c0_88, %c0_89] : memref<8x128xf32, #tpu.memory_space<vmem>>, vector<1x128xf32>
    %cst_90 = arith.constant dense<0.000000e+00> : vector<128xf32>
    %83 = vector.multi_reduction <add>, %81, %cst_90 [0] : vector<4x128xf32> to vector<128xf32>
    %84 = vector.shape_cast %83 : vector<128xf32> to vector<1x128xf32>
    %cst_91 = arith.constant 0.001953125 : f32
    %85 = vector.broadcast %cst_91 : f32 to vector<1x128xf32>
    %86 = arith.mulf %85, %84 : vector<1x128xf32>
    %87 = arith.addf %82, %86 : vector<1x128xf32>
    %c0_92 = arith.constant 0 : index
    %c0_93 = arith.constant 0 : index
    %88 = vector.load %arg7[%c0_92, %c0_93] : memref<8x128xf32, #tpu.memory_space<vmem>>, vector<1x128xf32>
    tpu.vector_store %arg7[%c0_92, %c0_93], %87 {strides = array<i32>} : memref<8x128xf32, #tpu.memory_space<vmem>>, vector<1x128xf32>,
    return
  }
  func.func @transform_6(%arg0: i32) -> (i32, i32) {
    %c0_i32 = arith.constant 0 : i32
    %c0_i32_0 = arith.constant 0 : i32
    %c0_i32_1 = arith.constant 0 : i32
    return %c0_i32, %c0_i32_0 : i32, i32
  }
}

</mosaic_0001>

<bundles_post_ra>
// kernel: tpu_custom_call.1
= control target key start
LH: loop header
LB: loop body
LE: loop exit
PB: predicated region body
PF: predicated region fallthrough
CT: control target
= control target key end

     0   :  { %11 = vsyncpa [#allocation6], 0  ;;  %s414_s21 = smov [#allocation2]   ;;  %s415_s23 = smov [#allocation3]   ;;  %v416_v0 = vmov 0.0   ;;  %s524_s0 = inlined_call_operand.hbm [shape: f32[16,128], index: 0, kind: input, shape index: {}]   ;;  %s525_s1 = inlined_call_operand.hbm [shape: f32[8,128], index: 1, kind: input, shape index: {}]   ;;  %s526_s2 = inlined_call_operand.vmem [shape: f32[4,128], index: 2, kind: input, shape index: {}]   ;;  %s527_s3 = inlined_call_operand.hbm [shape: f32[16,128], index: 3, kind: input, shape index: {}]   ;;  %s528_s4 = inlined_call_operand.vmem [shape: f32[8,128], index: 4, kind: input, shape index: {}]   ;;  %s529_s5 = inlined_call_operand.vmem [shape: f32[4,128], index: 5, kind: input, shape index: {}]   ;;  %s530_s6 = inlined_call_operand.hbm [shape: f32[8,128], index: 6, kind: output, shape index: {}]  }
   0x1   :  { %s19_s22 = sshll.u32 %s414_s21, 4  ;;  %s31_s24 = sshll.u32 %s415_s23, 4  ;;  %35 = vst [vmem:[#allocation5] sm:$0xff] %v416_v0  ;;  %s454_s22 = int_to_ptr.vmem [resolvable:$true] %s19_s22  ;;  %s32_s24 = int_to_ptr.vmem [resolvable:$true] %s31_s24 }
   0x2   :  { %s312_s27 = scalar_lea.hbm %s524_s0, 256 }
   0x3   :  { %p313_p0 = scmp.ne.s32.totalorder %s524_s0, %s312_s27  ;;  %p316_p1 = scmp.lt.u32.totalorder %s312_s27, %s524_s0 }
   0x5   :  { %p318_p2 = pnand %p316_p1, %p313_p0 }
   0x7   :  { %321 = shalt.err (!%p318_p2)  }
   0x8   :  { %s322_s8 = scalar_lea.vmem %s454_s22, 256  ;;  %s326_s9 = scalar_lea.vmem %s454_s22, 512 }
   0x9   :  { %p323_p3 = scmp.ne.s32.totalorder %s454_s22, %s322_s8  ;;  %p327_p4 = scmp.lt.s32.totalorder %s454_s22, %s454_s22 }
   0xa   :  { %p328_p5 = scmp.lt.s32.totalorder %s326_s9, %s322_s8 }
   0xc   :  { %p329_p6 = por %p328_p5, %p327_p4 }
   0xe   :  { %p330_p7 = pnand %p329_p6, %p323_p3 }
  0x10   :  { %333 = shalt.err (!%p330_p7)  }
  0x11   :  { %22 = dma.hbm_to_vmem [thread:$0]  %s524_s0, 256, %s454_s22, [#allocation4] }
  0x12   :  { %s334_s14 = scalar_lea.hbm %s527_s3, 256 }
  0x13   :  { %p335_p8 = scmp.ne.s32.totalorder %s527_s3, %s334_s14  ;;  %p338_p9 = scmp.lt.u32.totalorder %s334_s14, %s527_s3 }
  0x15   :  { %p340_p10 = pnand %p338_p9, %p335_p8 }
  0x17   :  { %343 = shalt.err (!%p340_p10)  }
  0x18   :  { %s344_s19 = scalar_lea.vmem %s32_s24, 256  ;;  %s348_s20 = scalar_lea.vmem %s32_s24, 512 }
  0x19   :  { %p345_p11 = scmp.ne.s32.totalorder %s32_s24, %s344_s19  ;;  %p349_p12 = scmp.lt.s32.totalorder %s32_s24, %s32_s24 }
  0x1a   :  { %p350_p13 = scmp.lt.s32.totalorder %s348_s20, %s344_s19 }
  0x1c   :  { %p351_p0 = por %p350_p13, %p349_p12 }
  0x1e   :  { %p352_p1 = pnand %p351_p0, %p345_p11 }
  0x20   :  { %355 = shalt.err (!%p352_p1)  }
  0x21   :  { %34 = dma.hbm_to_vmem [thread:$0]  %s527_s3, 256, %s32_s24, [#allocation4 + $0x2] }
  0x22   :  { %400 = dma.done.wait [#allocation4], 256 }
  0x23   :  { %401 = vsyncadd [#allocation4], 4294967040 }
  0x24   :  { %402 = dma.done.wait [#allocation4 + $0x2], 256 }
  0x25   :  { %403 = vsyncadd [#allocation4 + $0x2], 4294967040  ;;  %s417_s23 = smov [#allocation2 + $0x10]   ;;  %s356_s28 = scalar_lea.hbm %s525_s1, 128 }
  0x26   :  { %s50_s25 = sshll.u32 %s417_s23, 4  ;;  %p357_p2 = scmp.ne.s32.totalorder %s525_s1, %s356_s28  ;;  %s51_s25 = int_to_ptr.vmem [resolvable:$true] %s50_s25 }
  0x27   :  { %p360_p3 = scmp.lt.u32.totalorder %s356_s28, %s525_s1 }
  0x29   :  { %p362_p4 = pnand %p360_p3, %p357_p2 }
  0x2b   :  { %365 = shalt.err (!%p362_p4)  }
  0x2c   :  { %s366_s3 = scalar_lea.vmem %s51_s25, 128  ;;  %p371_p6 = scmp.lt.s32.totalorder %s51_s25, %s454_s22 }
  0x2d   :  { %p367_p5 = scmp.ne.s32.totalorder %s51_s25, %s366_s3  ;;  %p372_p7 = scmp.lt.s32.totalorder %s326_s9, %s366_s3 }
  0x2f   :  { %p373_p8 = por %p372_p7, %p371_p6 }
  0x31   :  { %p374_p9 = pnand %p373_p8, %p367_p5 }
  0x33   :  { %377 = shalt.err (!%p374_p9)  }
  0x34   :  { %53 = dma.hbm_to_vmem [thread:$0]  %s525_s1, 128, %s51_s25, [#allocation4 + $0x1]  ;;  %v88_v1 = vld [vmem:[%s528_s4] sm:$0xff] }
  0x35   :  { %89 = vst [vmem:[#allocation3 + $0x10] sm:$0xff] %v88_v1 }
  0x36   :  { %97 = vsyncadd [#allocation4 + $0x3], 128  ;;  %v98_v2 = vld [vmem:[#allocation2] sm:$0xff]  ;;  %v99_v3 = vld [vmem:[#allocation2 + $0x8] sm:$0xff] }
  0x37   :  { %v100_v4 = vld [vmem:[#allocation3] sm:$0xff]  ;;  %v101_v5 = vld [vmem:[#allocation3 + $0x8] sm:$0xff] }
  0x38   :  { %v102_v6 = vsub.f32 %v98_v2, %v100_v4  ;;  %v103_v7 = vsub.f32 %v99_v3, %v101_v5  ;;  %v106_v11 = vld [vmem:[#allocation5] sm:$0xff] }
  0x3a   :  { %v104_v8 = vand.u32 2147483647, %v102_v6  ;;  %v105_v9 = vand.u32 2147483647, %v103_v7 }
  0x3c   :  { %v107_v10 = vadd.f32 %v105_v9, %v104_v8 }
  0x3e   :  { %v108_v12 = vmul.f32 0.00048828125, %v107_v10 }
  0x40   :  { %v109_v13 = vadd.f32 %v108_v12, %v106_v11 }
  0x42   :  { %110 = vst [vmem:[#allocation5] sm:$0xff] %v109_v13 }
  0x43   :  { %404 = dma.done.wait [#allocation4 + $0x1], 128 }
  0x44   :  { %405 = vsyncadd [#allocation4 + $0x1], 4294967168 }
  0x45   :  { %406 = dma.done.wait [#allocation4 + $0x3], 128 }
  0x46   :  { %407 = vsyncadd [#allocation4 + $0x3], 4294967168  ;;  %v133_v14 = vld [vmem:[%s526_s2] sm:$0xf] }
  0x47   :  { %134 = vst [vmem:[#allocation2] sm:$0xf] %v133_v14 }
  0x48   :  { %159 = vsyncadd [#allocation4], 64  ;;  %v177_v15 = vld [vmem:[%s529_s5] sm:$0xf] }
  0x49   :  { %178 = vst [vmem:[#allocation3] sm:$0xf] %v177_v15 }
  0x4a   :  { %203 = vsyncadd [#allocation4 + $0x2], 64  ;;  %v204_v16 = vld [vmem:[#allocation2 + $0x10] sm:$0xff]  ;;  %v208_v20 = vld [vmem:[#allocation5] sm:$0xff] }
  0x4b   :  { %v205_v17 = vld [vmem:[#allocation3 + $0x10] sm:$0xff] }
  0x4c   :  { %v206_v18 = vsub.f32 %v204_v16, %v205_v17 }
  0x4e   :  { %v207_v19 = vand.u32 2147483647, %v206_v18 }
  0x50   :  { %v210_v21 = vmul.f32 0.0009765625, %v207_v19 }
  0x52   :  { %v211_v22 = vadd.f32 %v210_v21, %v208_v20 }
  0x54   :  { %212 = vst [vmem:[#allocation5] sm:$0xff] %v211_v22 }
  0x55   :  { %408 = dma.done.wait [#allocation4], 64 }
  0x56   :  { %409 = vsyncadd [#allocation4], 4294967232 }
  0x57   :  { %410 = dma.done.wait [#allocation4 + $0x2], 64 }
  0x58   :  { %411 = vsyncadd [#allocation4 + $0x2], 4294967232  ;;  %v218_v23 = vld [vmem:[#allocation2] sm:$0xf]  ;;  %vm223_vm0 = vcmask 1043456   ;;  %s418_s2 = smov [#allocation5]  }
  0x59   :  { %v219_v24 = vld [vmem:[#allocation3] sm:$0xf]  ;;  %s240_s5 = sshll.u32 %s418_s2, 4  ;;  %s241_s5 = int_to_ptr.vmem [resolvable:$true] %s240_s5 }
  0x5a   :  { %v220_v25 = vsub.f32 %v218_v23, %v219_v24  ;;  %s378_s13 = scalar_lea.vmem %s241_s5, 128  ;;  %p383_p11 = scmp.lt.s32.totalorder %s241_s5, %s241_s5 }
  0x5b   :  { %v222_v34 = vld [vmem:[#allocation5] sm:$0x1]  ;;  %p379_p10 = scmp.ne.s32.totalorder %s241_s5, %s378_s13  ;;  %p384_p12 = scmp.lt.s32.totalorder %s378_s13, %s378_s13 }
  0x5c   :  { %v221_v26 = vand.u32 2147483647, %v220_v25 }
  0x5d   :  { %p385_p13 = por %p384_p12, %p383_p11 }
  0x5e   :  { %v224_v27 = vsel %vm223_vm0, %v221_v26, 0.0 }
  0x5f   :  { %v225_v28 = vrot.slane %v224_v27, 4  ;;  %p386_p0 = pnand %p385_p13, %p379_p10 }
  0x61   :  { %v226_v29 = vadd.f32 %v225_v28, %v224_v27 }
  0x63   :  { %v227_v30 = vrot.slane %v226_v29, 2 }
  0x65   :  { %v228_v31 = vadd.f32 %v227_v30, %v226_v29 }
  0x67   :  { %v229_v32 = vrot.slane %v228_v31, 1 }
  0x69   :  { %v230_v33 = vadd.f32 %v229_v32, %v228_v31 }
  0x6b   :  { %v231_v35 = vmul.f32 0.001953125, %v230_v33 }
  0x6d   :  { %v232_v36 = vadd.f32 %v231_v35, %v222_v34 }
  0x6f   :  { %233 = vst [vmem:[#allocation5] sm:$0x1] %v232_v36 }
  0x70   :  { %389 = shalt.err (!%p386_p0)
}
  0x71   :  { %s390_s16 = scalar_lea.hbm %s530_s6, 128 }
  0x72   :  { %p391_p1 = scmp.ne.s32.totalorder %s530_s6, %s390_s16  ;;  %p394_p2 = scmp.lt.u32.totalorder %s390_s16, %s530_s6 }
  0x74   :  { %p396_p3 = pnand %p394_p2, %p391_p1 }
  0x76   :  { %399 = shalt.err (!%p396_p3)
}
  0x77   :  { %243 = dma.vmem_to_hbm [thread:$0]  %s241_s5, 128, %s530_s6, [#allocation6]  }
  0x78   :  { %412 = dma.done.wait [#allocation6], 128  }
  0x79   :  { %413 = vsyncadd [#allocation6], 4294967168 }
  0x7a   :  { %247 = vsyncpa [#allocation6], 1 }
  0x7b   :  { %248 = vsyncmov [#allocation4] }
  0x7e   :  { %s249_s23 = vpop.sfrf %248 }
  0x7f   :  { %p303_p4 = scmp.ne.s32.totalorder %s249_s23, 0 }
  0x81   :  { %253 = shalt.err (%p303_p4)  }
  0x82   :  { %255 = vsyncmov [#allocation4 + $0x1] }
  0x85   :  { %s256_s25 = vpop.sfrf %255 }
  0x86   :  { %p304_p5 = scmp.ne.s32.totalorder %s256_s25, 0 }
  0x88   :  { %260 = shalt.err (%p304_p5)  }
  0x89   :  { %262 = vsyncmov [#allocation4 + $0x2] }
  0x8c   :  { %s263_s26 = vpop.sfrf %262 }
  0x8d   :  { %p305_p6 = scmp.ne.s32.totalorder %s263_s26, 0 }
  0x8f   :  { %267 = shalt.err (%p305_p6)  }
  0x90   :  { %269 = vsyncmov [#allocation4 + $0x3] }
  0x93   :  { %s270_s27 = vpop.sfrf %269 }
  0x94   :  { %p306_p7 = scmp.ne.s32.totalorder %s270_s27, 0 }
  0x96   :  { %274 = shalt.err (%p306_p7)  }

</bundles_post_ra>
